<compile_context>
chip_gen: v5e
topology: v5e:2x2
jax: 0.10.0
libtpu: 0.0.40
codegen_flags: <defaults>
</compile_context>

<pallas_src>
import jax
import jax.numpy as jnp
from jax.experimental import pallas as pl
from jax.experimental.pallas import tpu as pltpu


_LANE = 128
_SUBLANE = 8
# Budget for block-related VMEM: double-buffered input + ~5 live f32
# block-sized temporaries.  Kept well under v7x's 64 MiB physical VMEM.
_BLOCK_VMEM_BUDGET = 40 * 1024 * 1024
_NUM_F32_TEMPS = 5
_VMEM_LIMIT_CAP = 56 * 1024 * 1024


def _round_up(x, m):
    return (x + m - 1) // m * m


def _make_tv_kernel(H, W):
    HW = H * W

    def kernel(mw_ref, x_ref, out_ref):
        # x_ref: (b, H*W) block -- each row is one flattened (H, W) slice, so
        # all diffs/rolls are per-row and the lane axis is dense even for
        # small W.  mw_ref: (1, H*W) f32 mask, zero at row-wrap lanes.
        x = x_ref[...].astype(jnp.float32)

        # Horizontal (W-axis) squared diffs: previous flattened element.
        # Row-wrap positions (j % W == 0) are removed by one precomputed-mask
        # multiply instead of an iota/compare/select over the whole tile.
        if W > 1:
            dw = pltpu.roll(x, shift=1, axis=1) - x
            s_w = jnp.sum(dw * dw * mw_ref[...])
        else:
            s_w = jnp.float32(0.0)

        # Vertical (H-axis) squared diffs: roll by W pairs each element with
        # the one a full row earlier.  The only invalid terms are the first W
        # lanes (wrap onto the last row) -- an aligned, contiguous head slice
        # whose contribution is subtracted (no per-element mask, no
        # sublane-offset slice / relayout copy).
        if H > 1:
            dh = pltpu.roll(x, shift=W, axis=1) - x
            head = dh[:, :W]
            s_h = jnp.sum(dh * dh) - jnp.sum(head * head)
        else:
            s_h = jnp.float32(0.0)

        # One lane-dense (1, 8, 128) partial tile per block:
        # s_h at [0, 0, 0], s_w at [0, 0, 1], zeros elsewhere.
        sub = jax.lax.broadcasted_iota(jnp.int32, out_ref.shape, 1)
        lane = jax.lax.broadcasted_iota(jnp.int32, out_ref.shape, 2)
        row0 = sub == 0
        tile = jnp.where(row0 & (lane == 0), s_h, 0.0)
        tile = jnp.where(row0 & (lane == 1), s_w, tile)
        out_ref[...] = tile

    return kernel


def tv_loss(x, tv_loss_weight: float = 1.0):
    """Pallas TPU implementation of TVLoss.forward(x) for NCHW input x."""
    N, C, H, W = x.shape
    NC = N * C
    HW = H * W

    # Lane-dense layout: one contiguous row per (H, W) slice.
    xf = x.reshape(NC, HW)

    # Layout-aware per-row VMEM footprint ((sublane, lane) padding to (8,128)).
    lanes = _round_up(HW, _LANE)
    in_row_bytes = lanes * x.dtype.itemsize
    f32_row_bytes = lanes * 4

    if NC < _SUBLANE:
        b = NC                                  # block == full (small) leading dim
        ncp = NC
    else:
        per_row = 2 * in_row_bytes + _NUM_F32_TEMPS * f32_row_bytes
        b_vmem = max(_SUBLANE,
                     (_BLOCK_VMEM_BUDGET // per_row) // _SUBLANE * _SUBLANE)
        ncp8 = _round_up(NC, _SUBLANE)
        # Keep >= 2 grid steps when possible so v7x can shard across both TCs.
        if ncp8 >= 2 * _SUBLANE:
            b_cap = max(_SUBLANE, (ncp8 // 2) // _SUBLANE * _SUBLANE)
        else:
            b_cap = ncp8
        b = int(min(b_vmem, b_cap, ncp8))
        ncp = _round_up(NC, b)

    if ncp > NC:
        # Zero rows contribute nothing to either TV sum (all diffs are zero
        # and rows never mix), so zero-padding is exact.
        xf = jnp.pad(xf, ((0, ncp - NC), (0, 0)))
    g = ncp // b

    # Precomputed horizontal-diff mask: zero at row-wrap lanes (j % W == 0).
    # Its index_map is constant, so the block stays resident across the grid.
    j = jnp.arange(HW, dtype=jnp.int32)
    mask_w = (j % W != 0).astype(jnp.float32).reshape(1, HW)

    b8 = max(_SUBLANE, _round_up(b, _SUBLANE))
    vmem_est = (2 * b8 * in_row_bytes
                + _NUM_F32_TEMPS * b8 * f32_row_bytes
                + (4 << 20))
    vmem_limit = int(min(_VMEM_LIMIT_CAP, max(32 << 20, vmem_est)))

    part = pl.pallas_call(
        _make_tv_kernel(H, W),
        out_shape=jax.ShapeDtypeStruct((g, 8, 128), jnp.float32),
        grid_spec=pltpu.PrefetchScalarGridSpec(
            num_scalar_prefetch=0,
            grid=(g,),
            in_specs=[
                pl.BlockSpec((1, HW), lambda i: (0, 0)),   # mask (resident)
                pl.BlockSpec((b, HW), lambda i: (i, 0)),   # input block
            ],
            out_specs=pl.BlockSpec((1, 8, 128), lambda i: (i, 0, 0)),
        ),
        compiler_params=pltpu.CompilerParams(
            dimension_semantics=("parallel",),             # independent blocks
            vmem_limit_bytes=vmem_limit,
        ),
    )(mask_w, xf)

    h_tv = jnp.sum(part[:, 0, 0])
    w_tv = jnp.sum(part[:, 0, 1])
    # NOTE: H == 1 or W == 1 makes count_h / count_w zero -> inf/nan, exactly
    # like the original PyTorch module.
    count_h = C * (H - 1) * W
    count_w = C * H * (W - 1)
    return tv_loss_weight * 2.0 * (h_tv / count_h + w_tv / count_w) / N


def _tv_loss_ref(x, tv_loss_weight: float = 1.0):
    # Pure-JAX reference mirroring the PyTorch module.
    N, C, H, W = x.shape
    count_h = C * (H - 1) * W
    count_w = C * H * (W - 1)
    h_tv = jnp.sum((x[:, :, 1:, :] - x[:, :, :-1, :]) ** 2)
    w_tv = jnp.sum((x[:, :, :, 1:] - x[:, :, :, :-1]) ** 2)
    return tv_loss_weight * 2.0 * (h_tv / count_h + w_tv / count_w) / N


if __name__ == "__main__":
    key = jax.random.PRNGKey(0)
    x = jax.random.normal(key, (2, 4, 16, 16), dtype=jnp.float32)

    out = jax.block_until_ready(tv_loss(x, tv_loss_weight=1.0))
    ref = jax.block_until_ready(_tv_loss_ref(x, tv_loss_weight=1.0))

    assert jnp.allclose(out, ref, rtol=1e-5, atol=1e-5), (out, ref)
    print("KERNEL_OK")
</pallas_src>

<mosaic_0001>
module attributes {stable_mosaic.version = 11 : i64} {
  func.func @kernel(%arg0: i32, %arg1: memref<1x256xf32, #tpu.memory_space<vmem>>, %arg2: memref<8x256xf32, #tpu.memory_space<vmem>>, %arg3: memref<1x8x128xf32, #tpu.memory_space<vmem>>) attributes {dimension_semantics = [#tpu.dimension_semantics<parallel>], iteration_bounds = array<i64: 1>, scalar_prefetch = 0 : i64, scratch_operands = 0 : i64, tpu.core_type = #tpu.core_type<tc>, window_params = [{pipeline_mode = #tpu.pipeline_mode<synchronous>, transform_indices = @transform_0, window_bounds = array<i64: 1, 256>}, {transform_indices = @transform_1, window_bounds = array<i64: 8, 256>}, {transform_indices = @transform_2, window_bounds = array<i64: 1, 8, 128>}]} {
    %c0 = arith.constant 0 : index
    %c0_0 = arith.constant 0 : index
    %0 = vector.load %arg2[%c0, %c0_0] : memref<8x256xf32, #tpu.memory_space<vmem>>, vector<8x256xf32>
    %c1_i32 = arith.constant 1 : i32
    %1 = tpu.dynamic_rotate %0 by %c1_i32 dim 1 : vector<8x256xf32>, i32 -> vector<8x256xf32>
    %2 = arith.subf %1, %0 : vector<8x256xf32>
    %3 = arith.mulf %2, %2 : vector<8x256xf32>
    %c0_1 = arith.constant 0 : index
    %c0_2 = arith.constant 0 : index
    %4 = vector.load %arg1[%c0_1, %c0_2] : memref<1x256xf32, #tpu.memory_space<vmem>>, vector<1x256xf32>
    %5 = vector.broadcast %4 : vector<1x256xf32> to vector<8x256xf32>
    %6 = arith.mulf %3, %5 : vector<8x256xf32>
    %7 = vector.shape_cast %6 : vector<8x256xf32> to vector<1x8x256xf32>
    %cst = arith.constant dense<0.000000e+00> : vector<1xf32>
    %8 = vector.multi_reduction <add>, %7, %cst [1, 2] : vector<1x8x256xf32> to vector<1xf32>
    %9 = vector.shape_cast %8 : vector<1xf32> to vector<1x1x1xf32>
    %10 = vector.extract %9[0, 0, 0] : f32 from vector<1x1x1xf32>
    %c16_i32 = arith.constant 16 : i32
    %11 = tpu.dynamic_rotate %0 by %c16_i32 dim 1 : vector<8x256xf32>, i32 -> vector<8x256xf32>
    %12 = arith.subf %11, %0 : vector<8x256xf32>
    %13 = vector.extract_strided_slice %12 {offsets = [0, 0], sizes = [8, 16], strides = [1, 1]} : vector<8x256xf32> to vector<8x16xf32>
    %14 = arith.mulf %12, %12 : vector<8x256xf32>
    %15 = vector.shape_cast %14 : vector<8x256xf32> to vector<1x8x256xf32>
    %cst_3 = arith.constant dense<0.000000e+00> : vector<1xf32>
    %16 = vector.multi_reduction <add>, %15, %cst_3 [1, 2] : vector<1x8x256xf32> to vector<1xf32>
    %17 = vector.shape_cast %16 : vector<1xf32> to vector<1x1x1xf32>
    %18 = vector.extract %17[0, 0, 0] : f32 from vector<1x1x1xf32>
    %19 = arith.mulf %13, %13 : vector<8x16xf32>
    %20 = vector.shape_cast %19 : vector<8x16xf32> to vector<1x8x16xf32>
    %cst_4 = arith.constant dense<0.000000e+00> : vector<1xf32>
    %21 = vector.multi_reduction <add>, %20, %cst_4 [1, 2] : vector<1x8x16xf32> to vector<1xf32>
    %22 = vector.shape_cast %21 : vector<1xf32> to vector<1x1x1xf32>
    %23 = vector.extract %22[0, 0, 0] : f32 from vector<1x1x1xf32>
    %24 = arith.subf %18, %23 : f32
    %25 = tpu.iota {dimensions = array<i32: 1>} : vector<1x8x128xi32>
    %26 = tpu.iota {dimensions = array<i32: 2>} : vector<1x8x128xi32>
    %c0_i32 = arith.constant 0 : i32
    %27 = vector.broadcast %c0_i32 : i32 to vector<1x8x128xi32>
    %28 = arith.cmpi eq, %25, %27 : vector<1x8x128xi32>
    %c0_i32_5 = arith.constant 0 : i32
    %29 = vector.broadcast %c0_i32_5 : i32 to vector<1x8x128xi32>
    %30 = arith.cmpi eq, %26, %29 : vector<1x8x128xi32>
    %31 = arith.andi %28, %30 : vector<1x8x128xi1>
    %cst_6 = arith.constant 0.000000e+00 : f32
    %32 = vector.broadcast %24 : f32 to vector<1x8x128xf32>
    %33 = vector.broadcast %cst_6 : f32 to vector<1x8x128xf32>
    %34 = arith.select %31, %32, %33 : vector<1x8x128xi1>, vector<1x8x128xf32>
    %c1_i32_7 = arith.constant 1 : i32
    %35 = vector.broadcast %c1_i32_7 : i32 to vector<1x8x128xi32>
    %36 = arith.cmpi eq, %26, %35 : vector<1x8x128xi32>
    %37 = arith.andi %28, %36 : vector<1x8x128xi1>
    %38 = vector.broadcast %10 : f32 to vector<1x8x128xf32>
    %39 = arith.select %37, %38, %34 : vector<1x8x128xi1>, vector<1x8x128xf32>
    %c0_8 = arith.constant 0 : index
    %c0_9 = arith.constant 0 : index
    %c0_10 = arith.constant 0 : index
    %40 = vector.load %arg3[%c0_8, %c0_9, %c0_10] : memref<1x8x128xf32, #tpu.memory_space<vmem>>, vector<1x8x128xf32>
    tpu.vector_store %arg3[%c0_8, %c0_9, %c0_10], %39 {strides = array<i32>} : memref<1x8x128xf32, #tpu.memory_space<vmem>>, vector<1x8x128xf32>,
    return
  }
  func.func @transform_0(%arg0: i32) -> (i32, i32) {
    %c0_i32 = arith.constant 0 : i32
    %c0_i32_0 = arith.constant 0 : i32
    %c0_i32_1 = arith.constant 0 : i32
    return %c0_i32, %c0_i32_0 : i32, i32
  }
  func.func @transform_1(%arg0: i32) -> (i32, i32) {
    %c0_i32 = arith.constant 0 : i32
    %c0_i32_0 = arith.constant 0 : i32
    return %arg0, %c0_i32 : i32, i32
  }
  func.func @transform_2(%arg0: i32) -> (i32, i32, i32) {
    %c0_i32 = arith.constant 0 : i32
    %c0_i32_0 = arith.constant 0 : i32
    %c0_i32_1 = arith.constant 0 : i32
    return %arg0, %c0_i32, %c0_i32_0 : i32, i32, i32
  }
}

</mosaic_0001>

<bundles_post_ra>
// kernel: tpu_custom_call.1
= control target key start
LH: loop header
LB: loop body
LE: loop exit
PB: predicated region body
PF: predicated region fallthrough
CT: control target
= control target key end

     0   :  { %7 = vsyncpa [#allocation3], 0  ;;  %s264_s0 = inlined_call_operand.hbm [shape: f32[1,256], index: 0, kind: input, shape index: {}]   ;;  %s265_s1 = inlined_call_operand.hbm [shape: f32[8,256], index: 1, kind: input, shape index: {}]   ;;  %s266_s2 = inlined_call_operand.hbm [shape: f32[1,8,128], index: 2, kind: output, shape index: {}]  }
   0x1   :  { %8 = vsyncpa [#allocation6], 0 }
   0x2   :  { %9 = vsyncpa [#allocation4], 0  ;;  %s15_s11 = sshll.u32 %s264_s0, 4  ;;  %s225_s12 = smov [#allocation2]   ;;  %s16_s11 = int_to_ptr.hbm [resolvable:$true] %s15_s11 }
   0x3   :  { %s17_s13 = sshll.u32 %s225_s12, 4  ;;  %s26_s16 = sshll.u32 %s265_s1, 4  ;;  %s18_s13 = int_to_ptr.vmem [resolvable:$true] %s17_s13  ;;  %s27_s16 = int_to_ptr.hbm [resolvable:$true] %s26_s16 }
   0x4   :  { %20 = dma.hbm_to_vmem [thread:$0]  %s16_s11, 32, %s18_s13, [#allocation3]  }
   0x5   :  { %s226_s17 = smov [#allocation5]  }
   0x6   :  { %s28_s18 = sshll.u32 %s226_s17, 4  ;;  %s29_s18 = int_to_ptr.vmem [resolvable:$true] %s28_s18 }
   0x7   :  { %31 = dma.hbm_to_vmem [thread:$0]  %s27_s16, 256, %s29_s18, [#allocation6]  }
   0x8   :  { %219 = dma.done.wait [#allocation3], 32  }
   0x9   :  { %220 = vsyncadd [#allocation3], 4294967264 }
   0xa   :  { %221 = dma.done.wait [#allocation6], 256  }
   0xb   :  { %222 = vsyncadd [#allocation6], 4294967040  ;;  %v40_v0 = vld [vmem:[#allocation5] sm:$0xff]  ;;  %s227_s0 = smov 16   ;;  %s228_s19 = smov 1   ;;  %v41_v1 = vld [vmem:[#allocation5 + $0x8] sm:$0xff]  ;;  %v46_v2 = vlaneseq }
   0xc   :  { %73 = vrot.lane.b32.xlu1 %v40_v0, %s227_s0  ;;  %42 = vrot.lane.b32.xlu0 %v40_v0, %s228_s19  ;;  %v55_v6 = vld [vmem:[#allocation2] sm:$0x3]  ;;  %vm94_vm2 = vcmask 130048   ;;  %s229_s22 = smov [#allocation7]   ;;  %s125_s27 = sshll.u32 %s266_s2, 4  ;;  %s126_s27 = int_to_ptr.hbm [resolvable:$true] %s125_s27 }
   0xd   :  { %v251_v5 = vand.u32 127, %v46_v2  ;;  %v57_v12 = vperm.slane %v55_v6, 0  ;;  %v58_v16 = vperm.slane %v55_v6, 1  ;;  %v107_v49 = vshrl.u32 %v46_v2, 7  ;;  %s123_s23 = sshll.u32 %s229_s22, 4  ;;  %s124_s23 = int_to_ptr.vmem [resolvable:$true] %s123_s23 }
   0xf   :  { %vm77_vm0 = vcmp.lt.s32.totalorder %v251_v5, 16  ;;  %vm48_vm1 = vcmp.lt.s32.totalorder %v251_v5, 1  ;;  %vm108_vm3 = vcmp.eq.s32.totalorder %v107_v49, 0  ;;  %vm109_vm4 = vcmp.eq.s32.totalorder %v251_v5, 0 }
  0x10   :  { %vm113_vm5 = vcmp.eq.s32.totalorder %v251_v5, 1  ;;  %vm110_vm6 = vmand %vm108_vm3, %vm109_vm4 }
  0x11   :  { %vm114_vm7 = vmand %vm108_vm3, %vm113_vm5 }
  0x14   :  { %75 = vrot.lane.b32.xlu1 %v41_v1, %s227_s0  ;;  %44 = vrot.lane.b32.xlu0 %v41_v1, %s228_s19 }
  0x7e   :  { %v74_v3 = vpop.permute.xlu1 %73  ;;  %v43_v4 = vpop.permute.xlu0 %42 }
  0x86   :  { %v76_v7 = vpop.permute.xlu1 %75  ;;  %v45_v8 = vpop.permute.xlu0 %44 }
  0x87   :  { %v79_v9 = vsel %vm77_vm0, %v76_v7, %v74_v3  ;;  %v49_v10 = vsel %vm48_vm1, %v43_v4, %v45_v8  ;;  %v50_v11 = vsel %vm48_vm1, %v45_v8, %v43_v4  ;;  %v78_v20 = vsel %vm77_vm0, %v74_v3, %v76_v7 }
  0x88   :  { %v80_v13 = vsub.f32 %v79_v9, %v40_v0  ;;  %v51_v14 = vsub.f32 %v50_v11, %v40_v0  ;;  %v52_v15 = vsub.f32 %v49_v10, %v41_v1  ;;  %v81_v24 = vsub.f32 %v78_v20, %v41_v1 }
  0x8a   :  { %v53_v17 = vmul.f32 %v51_v14, %v51_v14  ;;  %v54_v18 = vmul.f32 %v52_v15, %v52_v15  ;;  %v82_v19 = vmul.f32 %v80_v13, %v80_v13  ;;  %v83_v26 = vmul.f32 %v81_v24, %v81_v24 }
  0x8c   :  { %v95_v21 = vsel %vm94_vm2, %v82_v19, 0.0  ;;  %v61_v22 = vmul.f32 %v57_v12, %v53_v17  ;;  %v62_v23 = vmul.f32 %v58_v16, %v54_v18  ;;  %v84_v27 = vadd.f32 %v83_v26, %v82_v19 }
  0x8d   :  { %96 = vadd.xlane.f32.xlu0 %v95_v21 }
  0x8e   :  { %v63_v25 = vadd.f32 %v62_v23, %v61_v22 }
  0x90   :  { %64 = vadd.xlane.f32.xlu2 %v63_v25 }
  0x98   :  { %85 = vadd.xlane.f32.xlu2 %v84_v27 }
 0x100   :  { %v97_v28 = vpop.xlane.xlu0 %96 }
 0x101   :  { %v98_v29 = vrot.slane %v97_v28, 4 }
 0x103   :  { %v65_v30 = vpop.xlane.xlu2 %64  ;;  %v99_v33 = vadd.f32 %v98_v29, %v97_v28 }
 0x104   :  { %v66_v31 = vrot.slane %v65_v30, 4 }
 0x105   :  { %v100_v36 = vrot.slane %v99_v33, 2 }
 0x106   :  { %v67_v32 = vadd.f32 %v66_v31, %v65_v30 }
 0x107   :  { %v101_v42 = vadd.f32 %v100_v36, %v99_v33 }
 0x108   :  { %v68_v34 = vrot.slane %v67_v32, 2 }
 0x109   :  { %v102_v45 = vrot.slane %v101_v42, 1 }
 0x10a   :  { %v69_v35 = vadd.f32 %v68_v34, %v67_v32 }
 0x10b   :  { %v86_v37 = vpop.xlane.xlu2 %85  ;;  %v103_v48 = vadd.f32 %v102_v45, %v101_v42 }
 0x10c   :  { %v87_v38 = vrot.slane %v86_v37, 4  ;;  %v70_v39 = vrot.slane %v69_v35, 1 }
 0x10e   :  { %v88_v40 = vadd.f32 %v87_v38, %v86_v37  ;;  %v71_v41 = vadd.f32 %v70_v39, %v69_v35 }
 0x110   :  { %v89_v43 = vrot.slane %v88_v40, 2  ;;  %136 = vpush %v71_v41 }
 0x112   :  { %v90_v44 = vadd.f32 %v89_v43, %v88_v40 }
 0x114   :  { %v91_v46 = vrot.slane %v90_v44, 1 }
 0x116   :  { %v92_v47 = vadd.f32 %v91_v46, %v90_v44 }
 0x118   :  { %138 = vpush %v92_v47 }
 0x119   :  { %140 = vpush %v103_v48 }
 0x141   :  { %s137_s1 = spop %136 }
 0x142   :  { %v115_v51 = vstv %s137_s1 }
 0x149   :  { %s139_s20 = spop %138 }
 0x14a   :  { %s141_s21 = spop %140 }
 0x14b   :  { %s105_s24 = ssub.f32 %s139_s20, %s141_s21 }
 0x14d   :  { %v111_v50 = vstv %s105_s24 }
 0x14e   :  { %v112_v52 = vsel %vm110_vm6, %v111_v50, 0.0 }
 0x14f   :  { %v116_v53 = vsel %vm114_vm7, %v115_v51, %v112_v52 }
 0x150   :  { %117 = vst [vmem:[#allocation7] sm:$0xff] %v116_v53 }
 0x151   :  { %128 = dma.vmem_to_hbm [thread:$0]  %s124_s23, 128, %s126_s27, [#allocation4]  }
 0x152   :  { %223 = dma.done.wait [#allocation4], 128  }
 0x153   :  { %224 = vsyncadd [#allocation4], 4294967168 }
 0x154   :  { %133 = vsyncpa [#allocation3], 1 }
 0x155   :  { %134 = vsyncpa [#allocation6], 1 }
 0x156   :  { %135 = vsyncpa [#allocation4], 1 }

</bundles_post_ra>
